<compile_context>
chip_gen: v7x
topology: tpu7x:2x2x1
jax: 0.10.0
libtpu: 0.0.40
codegen_flags: <defaults>
</compile_context>

<pallas_src>
import jax
import jax.numpy as jnp
from jax import lax
from jax.experimental import pallas as pl
from jax.experimental.pallas import tpu as pltpu


def adain_kernel(sm_ref, d_ref, w2_ref, b2_ref, w4g_ref, b4g_ref, w4b_ref, b4b_ref,
                 out_ref):
    # ---- style branch: MLP on the T-averaged style vector -> (gamma, beta) ----
    sm = sm_ref[...]                                                # (Nb, S) f32
    h = jnp.dot(sm, w2_ref[...], preferred_element_type=jnp.float32) + b2_ref[...]
    # ELU(alpha=1). Dropout(0.1) is identity in eval mode.
    h = jnp.where(h > 0, h, jnp.exp(jnp.minimum(h, 0.0)) - 1.0)
    gamma = jnp.dot(h, w4g_ref[...], preferred_element_type=jnp.float32) + b4g_ref[...]
    beta = jnp.dot(h, w4b_ref[...], preferred_element_type=jnp.float32) + b4b_ref[...]

    # ---- content branch: InstanceNorm1d over the content axis ----
    # Single-pass mean / variance (E[x^2] - mu^2), biased var, eps=1e-5.
    d = d_ref[...].astype(jnp.float32)                              # (Nb, C)
    inv_c = jnp.float32(1.0 / d.shape[-1])
    mu = jnp.sum(d, axis=-1, keepdims=True) * inv_c
    ex2 = jnp.sum(d * d, axis=-1, keepdims=True) * inv_c
    var = ex2 - mu * mu
    d_norm = (d - mu) * lax.rsqrt(var + 1e-5)

    # C=64 < 128 lanes => masked store; acceptable, C is not split across the grid.
    out_ref[...] = ((1.0 + gamma) * d_norm + beta).astype(out_ref.dtype)


def adain_norm_2d(s, d, w2, b2, w4, b4, *, block_n=1024):
    """s: (N, T, S), d: (N, C); weights stored as (in, out); biases (1, out)."""
    N, _, S = s.shape
    C = d.shape[-1]
    assert block_n % 8 == 0, "row block must respect the 8-sublane constraint"

    # Style-branch preprocessing in plain XLA (fuses with producers upstream).
    s_mean = jnp.mean(s.astype(jnp.float32), axis=1)                # (N, S)

    # Pre-split affine4 into lane-aligned gamma / beta halves.
    w4g, w4b = w4[:, :C], w4[:, C:]                                 # (S, C) each
    b4g, b4b = b4[:, :C], b4[:, C:]                                 # (1, C) each

    nb = N if N <= block_n else block_n                             # full dim or 8-aligned tile
    grid = (pl.cdiv(N, nb),)

    def row(width):
        return pl.BlockSpec((nb, width), lambda i: (i, 0))

    def rep(r, c):
        return pl.BlockSpec((r, c), lambda i: (0, 0))

    return pl.pallas_call(
        adain_kernel,
        out_shape=jax.ShapeDtypeStruct((N, C), d.dtype),
        grid_spec=pltpu.PrefetchScalarGridSpec(
            num_scalar_prefetch=0,
            grid=grid,
            in_specs=[
                row(S),          # s_mean (N, S)
                row(C),          # d      (N, C)
                rep(S, S),       # w2
                rep(1, S),       # b2
                rep(S, C),       # w4_gamma
                rep(1, C),       # b4_gamma
                rep(S, C),       # w4_beta
                rep(1, C),       # b4_beta
            ],
            out_specs=row(C),
        ),
        compiler_params=pltpu.CompilerParams(
            dimension_semantics=("parallel",),      # megacore sharding on v7x
            vmem_limit_bytes=32 * 1024 * 1024,      # safe on v5e/v6e/v7x
        ),
    )(s_mean, d, w2, b2, w4g, b4g, w4b, b4b)


def adain_reference(s, d, w2, b2, w4, b4):
    """Pure-JAX reference mirroring the PyTorch forward (first=True, eval mode)."""
    C = d.shape[-1]
    s_mean = jnp.mean(s, axis=1)
    h = s_mean @ w2 + b2[0]
    h = jnp.where(h > 0, h, jnp.exp(jnp.minimum(h, 0.0)) - 1.0)
    gb = h @ w4 + b4[0]
    gamma, beta = gb[:, :C], gb[:, C:]
    mu = jnp.mean(d, axis=-1, keepdims=True)
    var = jnp.mean((d - mu) ** 2, axis=-1, keepdims=True)
    d_norm = (d - mu) * lax.rsqrt(var + 1e-5)
    return (1.0 + gamma) * d_norm + beta


def _make_inputs(n, t, s_dims, c_dim, key):
    ks, kd, kw2, kb2, kw4, kb4 = jax.random.split(key, 6)
    s = jax.random.normal(ks, (n, t, s_dims), dtype=jnp.float32)
    d = jax.random.normal(kd, (n, c_dim), dtype=jnp.float32)
    # Deterministic parameter init (Linear weights stored as (in, out)).
    w2 = jax.random.normal(kw2, (s_dims, s_dims), dtype=jnp.float32) * 0.1
    b2 = jax.random.normal(kb2, (1, s_dims), dtype=jnp.float32) * 0.1
    w4 = jax.random.normal(kw4, (s_dims, 2 * c_dim), dtype=jnp.float32) * 0.1
    b4 = jax.random.normal(kb4, (1, 2 * c_dim), dtype=jnp.float32) * 0.1
    # TODO(synk): affine3 is declared in __init__ but never used in forward; omitted.
    return s, d, w2, b2, w4, b4


if __name__ == "__main__":
    T, S, C = 8, 32, 64   # style seq len, style_dims, content_dim

    # 1) Small, module-consistent shapes (grid of 1, full-dim blocks).
    N = 2
    args = _make_inputs(N, T, S, C, jax.random.PRNGKey(0))
    out = adain_norm_2d(*args)
    jax.block_until_ready(out)
    ref = adain_reference(*args)
    assert out.shape == (N, C)
    assert jnp.allclose(out, ref, atol=1e-4, rtol=1e-4)

    # 2) Batched shapes exercising the tiled, double-buffered, megacore-parallel path.
    N2 = 3072
    args2 = _make_inputs(N2, T, S, C, jax.random.PRNGKey(1))
    out2 = adain_norm_2d(*args2, block_n=1024)
    jax.block_until_ready(out2)
    ref2 = adain_reference(*args2)
    assert out2.shape == (N2, C)
    assert jnp.allclose(out2, ref2, atol=2e-4, rtol=2e-4)

    print("KERNEL_OK")
</pallas_src>

<mosaic_0001>
module attributes {stable_mosaic.version = 11 : i64} {
  func.func @adain_kernel(%arg0: i32, %arg1: memref<2x32xf32, #tpu.memory_space<vmem>>, %arg2: memref<2x64xf32, #tpu.memory_space<vmem>>, %arg3: memref<32x32xf32, #tpu.memory_space<vmem>>, %arg4: memref<1x32xf32, #tpu.memory_space<vmem>>, %arg5: memref<32x64xf32, #tpu.memory_space<vmem>>, %arg6: memref<1x64xf32, #tpu.memory_space<vmem>>, %arg7: memref<32x64xf32, #tpu.memory_space<vmem>>, %arg8: memref<1x64xf32, #tpu.memory_space<vmem>>, %arg9: memref<2x64xf32, #tpu.memory_space<vmem>>) attributes {dimension_semantics = [#tpu.dimension_semantics<parallel>], iteration_bounds = array<i64: 1>, scalar_prefetch = 0 : i64, scratch_operands = 0 : i64, tpu.core_type = #tpu.core_type<tc>, window_params = [{transform_indices = @transform_0, window_bounds = array<i64: 2, 32>}, {transform_indices = @transform_1, window_bounds = array<i64: 2, 64>}, {pipeline_mode = #tpu.pipeline_mode<synchronous>, transform_indices = @transform_2, window_bounds = array<i64: 32, 32>}, {pipeline_mode = #tpu.pipeline_mode<synchronous>, transform_indices = @transform_3, window_bounds = array<i64: 1, 32>}, {pipeline_mode = #tpu.pipeline_mode<synchronous>, transform_indices = @transform_4, window_bounds = array<i64: 32, 64>}, {pipeline_mode = #tpu.pipeline_mode<synchronous>, transform_indices = @transform_5, window_bounds = array<i64: 1, 64>}, {pipeline_mode = #tpu.pipeline_mode<synchronous>, transform_indices = @transform_6, window_bounds = array<i64: 32, 64>}, {pipeline_mode = #tpu.pipeline_mode<synchronous>, transform_indices = @transform_7, window_bounds = array<i64: 1, 64>}, {transform_indices = @transform_8, window_bounds = array<i64: 2, 64>}]} {
    %c0 = arith.constant 0 : index
    %c0_0 = arith.constant 0 : index
    %0 = vector.load %arg1[%c0, %c0_0] : memref<2x32xf32, #tpu.memory_space<vmem>>, vector<2x32xf32>
    %c0_1 = arith.constant 0 : index
    %c0_2 = arith.constant 0 : index
    %1 = vector.load %arg3[%c0_1, %c0_2] : memref<32x32xf32, #tpu.memory_space<vmem>>, vector<32x32xf32>
    %cst = arith.constant dense<0.000000e+00> : vector<2x32xf32>
    %2 = tpu.matmul %0, %1, %cst {dimension_numbers = #tpu.dot_dimension_numbers<[1], [0], [0], [1], [0, 0, 1, 1], [], []>} : vector<2x32xf32>, vector<32x32xf32>, vector<2x32xf32> -> vector<2x32xf32>
    %c0_3 = arith.constant 0 : index
    %c0_4 = arith.constant 0 : index
    %3 = vector.load %arg4[%c0_3, %c0_4] : memref<1x32xf32, #tpu.memory_space<vmem>>, vector<1x32xf32>
    %4 = vector.broadcast %3 : vector<1x32xf32> to vector<2x32xf32>
    %5 = arith.addf %2, %4 : vector<2x32xf32>
    %cst_5 = arith.constant 0.000000e+00 : f32
    %6 = vector.broadcast %cst_5 : f32 to vector<2x32xf32>
    %7 = arith.cmpf ogt, %5, %6 : vector<2x32xf32>
    %cst_6 = arith.constant 0.000000e+00 : f32
    %8 = vector.broadcast %cst_6 : f32 to vector<2x32xf32>
    %9 = arith.minimumf %5, %8 : vector<2x32xf32>
    %10 = math.exp %9 : vector<2x32xf32>
    %cst_7 = arith.constant 1.000000e+00 : f32
    %11 = vector.broadcast %cst_7 : f32 to vector<2x32xf32>
    %12 = arith.subf %10, %11 : vector<2x32xf32>
    %13 = arith.select %7, %5, %12 : vector<2x32xi1>, vector<2x32xf32>
    %c0_8 = arith.constant 0 : index
    %c0_9 = arith.constant 0 : index
    %14 = vector.load %arg5[%c0_8, %c0_9] : memref<32x64xf32, #tpu.memory_space<vmem>>, vector<32x64xf32>
    %cst_10 = arith.constant dense<0.000000e+00> : vector<2x64xf32>
    %15 = tpu.matmul %13, %14, %cst_10 {dimension_numbers = #tpu.dot_dimension_numbers<[1], [0], [0], [1], [0, 0, 1, 1], [], []>} : vector<2x32xf32>, vector<32x64xf32>, vector<2x64xf32> -> vector<2x64xf32>
    %c0_11 = arith.constant 0 : index
    %c0_12 = arith.constant 0 : index
    %16 = vector.load %arg6[%c0_11, %c0_12] : memref<1x64xf32, #tpu.memory_space<vmem>>, vector<1x64xf32>
    %17 = vector.broadcast %16 : vector<1x64xf32> to vector<2x64xf32>
    %18 = arith.addf %15, %17 : vector<2x64xf32>
    %c0_13 = arith.constant 0 : index
    %c0_14 = arith.constant 0 : index
    %19 = vector.load %arg7[%c0_13, %c0_14] : memref<32x64xf32, #tpu.memory_space<vmem>>, vector<32x64xf32>
    %cst_15 = arith.constant dense<0.000000e+00> : vector<2x64xf32>
    %20 = tpu.matmul %13, %19, %cst_15 {dimension_numbers = #tpu.dot_dimension_numbers<[1], [0], [0], [1], [0, 0, 1, 1], [], []>} : vector<2x32xf32>, vector<32x64xf32>, vector<2x64xf32> -> vector<2x64xf32>
    %c0_16 = arith.constant 0 : index
    %c0_17 = arith.constant 0 : index
    %21 = vector.load %arg8[%c0_16, %c0_17] : memref<1x64xf32, #tpu.memory_space<vmem>>, vector<1x64xf32>
    %22 = vector.broadcast %21 : vector<1x64xf32> to vector<2x64xf32>
    %23 = arith.addf %20, %22 : vector<2x64xf32>
    %c0_18 = arith.constant 0 : index
    %c0_19 = arith.constant 0 : index
    %24 = vector.load %arg2[%c0_18, %c0_19] : memref<2x64xf32, #tpu.memory_space<vmem>>, vector<2x64xf32>
    %cst_20 = arith.constant dense<0.000000e+00> : vector<2xf32>
    %25 = vector.multi_reduction <add>, %24, %cst_20 [1] : vector<2x64xf32> to vector<2xf32>
    %26 = vector.shape_cast %25 : vector<2xf32> to vector<2x1xf32>
    %cst_21 = arith.constant 1.562500e-02 : f32
    %27 = vector.broadcast %cst_21 : f32 to vector<2x1xf32>
    %28 = arith.mulf %26, %27 : vector<2x1xf32>
    %29 = arith.mulf %24, %24 : vector<2x64xf32>
    %cst_22 = arith.constant dense<0.000000e+00> : vector<2xf32>
    %30 = vector.multi_reduction <add>, %29, %cst_22 [1] : vector<2x64xf32> to vector<2xf32>
    %31 = vector.shape_cast %30 : vector<2xf32> to vector<2x1xf32>
    %cst_23 = arith.constant 1.562500e-02 : f32
    %32 = vector.broadcast %cst_23 : f32 to vector<2x1xf32>
    %33 = arith.mulf %31, %32 : vector<2x1xf32>
    %34 = arith.mulf %28, %28 : vector<2x1xf32>
    %35 = arith.subf %33, %34 : vector<2x1xf32>
    %36 = vector.broadcast %28 : vector<2x1xf32> to vector<2x64xf32>
    %37 = arith.subf %24, %36 : vector<2x64xf32>
    %cst_24 = arith.constant 9.99999974E-6 : f32
    %38 = vector.broadcast %cst_24 : f32 to vector<2x1xf32>
    %39 = arith.addf %35, %38 : vector<2x1xf32>
    %40 = math.rsqrt %39 : vector<2x1xf32>
    %41 = vector.broadcast %40 : vector<2x1xf32> to vector<2x64xf32>
    %42 = arith.mulf %37, %41 : vector<2x64xf32>
    %cst_25 = arith.constant 1.000000e+00 : f32
    %43 = vector.broadcast %cst_25 : f32 to vector<2x64xf32>
    %44 = arith.addf %43, %18 : vector<2x64xf32>
    %45 = arith.mulf %44, %42 : vector<2x64xf32>
    %46 = arith.addf %45, %23 : vector<2x64xf32>
    %c0_26 = arith.constant 0 : index
    %c0_27 = arith.constant 0 : index
    %47 = vector.load %arg9[%c0_26, %c0_27] : memref<2x64xf32, #tpu.memory_space<vmem>>, vector<2x64xf32>
    tpu.vector_store %arg9[%c0_26, %c0_27], %46 {strides = array<i32>} : memref<2x64xf32, #tpu.memory_space<vmem>>, vector<2x64xf32>,
    return
  }
  func.func @transform_0(%arg0: i32) -> (i32, i32) {
    %c0_i32 = arith.constant 0 : i32
    %c0_i32_0 = arith.constant 0 : i32
    return %arg0, %c0_i32 : i32, i32
  }
  func.func @transform_1(%arg0: i32) -> (i32, i32) {
    %c0_i32 = arith.constant 0 : i32
    %c0_i32_0 = arith.constant 0 : i32
    return %arg0, %c0_i32 : i32, i32
  }
  func.func @transform_2(%arg0: i32) -> (i32, i32) {
    %c0_i32 = arith.constant 0 : i32
    %c0_i32_0 = arith.constant 0 : i32
    %c0_i32_1 = arith.constant 0 : i32
    return %c0_i32, %c0_i32_0 : i32, i32
  }
  func.func @transform_3(%arg0: i32) -> (i32, i32) {
    %c0_i32 = arith.constant 0 : i32
    %c0_i32_0 = arith.constant 0 : i32
    %c0_i32_1 = arith.constant 0 : i32
    return %c0_i32, %c0_i32_0 : i32, i32
  }
  func.func @transform_4(%arg0: i32) -> (i32, i32) {
    %c0_i32 = arith.constant 0 : i32
    %c0_i32_0 = arith.constant 0 : i32
    %c0_i32_1 = arith.constant 0 : i32
    return %c0_i32, %c0_i32_0 : i32, i32
  }
  func.func @transform_5(%arg0: i32) -> (i32, i32) {
    %c0_i32 = arith.constant 0 : i32
    %c0_i32_0 = arith.constant 0 : i32
    %c0_i32_1 = arith.constant 0 : i32
    return %c0_i32, %c0_i32_0 : i32, i32
  }
  func.func @transform_6(%arg0: i32) -> (i32, i32) {
    %c0_i32 = arith.constant 0 : i32
    %c0_i32_0 = arith.constant 0 : i32
    %c0_i32_1 = arith.constant 0 : i32
    return %c0_i32, %c0_i32_0 : i32, i32
  }
  func.func @transform_7(%arg0: i32) -> (i32, i32) {
    %c0_i32 = arith.constant 0 : i32
    %c0_i32_0 = arith.constant 0 : i32
    %c0_i32_1 = arith.constant 0 : i32
    return %c0_i32, %c0_i32_0 : i32, i32
  }
  func.func @transform_8(%arg0: i32) -> (i32, i32) {
    %c0_i32 = arith.constant 0 : i32
    %c0_i32_0 = arith.constant 0 : i32
    return %arg0, %c0_i32 : i32, i32
  }
}

</mosaic_0001>

<bundles_post_ra>
// kernel: tpu_custom_call.1
= control target key start
LH: loop header
LB: loop body
LE: loop exit
PB: predicated region body
PF: predicated region fallthrough
CT: control target
= control target key end

     0   :  { %13 = vsyncpa [#allocation3], 0  ;;  %s728_s0 = inlined_call_operand.hbm [shape: f32[2,32], index: 0, kind: input, shape index: {}]   ;;  %s729_s1 = inlined_call_operand.vmem [shape: f32[2,64], index: 1, kind: input, shape index: {}]   ;;  %s730_s2 = inlined_call_operand.hbm [shape: f32[32,32], index: 2, kind: input, shape index: {}]   ;;  %s731_s3 = inlined_call_operand.vmem [shape: f32[1,32], index: 3, kind: input, shape index: {}]   ;;  %s732_s4 = inlined_call_operand.hbm [shape: f32[32,64], index: 4, kind: input, shape index: {}]   ;;  %s733_s5 = inlined_call_operand.vmem [shape: f32[1,64], index: 5, kind: input, shape index: {}]   ;;  %s734_s6 = inlined_call_operand.hbm [shape: f32[32,64], index: 6, kind: input, shape index: {}]   ;;  %s735_s7 = inlined_call_operand.vmem [shape: f32[1,64], index: 7, kind: input, shape index: {}]   ;;  %s736_s8 = inlined_call_operand.hbm [shape: f32[2,64], index: 8, kind: output, shape index: {}]  }
   0x1   :  { %14 = vsyncpa [#allocation6], 0 }
   0x2   :  { %15 = vsyncpa [#allocation9], 0 }
   0x3   :  { %16 = vsyncpa [#allocation4], 0  ;;  %s583_s27 = smov [#allocation5]   ;;  %s465_s9 = scalar_lea.hbm %s730_s2, 512 }
   0x4   :  { %s34_s28 = sshll.u32 %s583_s27, 4  ;;  %p466_p0 = scmp.ne.s32.totalorder %s730_s2, %s465_s9  ;;  %s35_s28 = int_to_ptr.vmem [resolvable:$true] %s34_s28 }
   0x5   :  { %p469_p1 = scmp.lt.u32.totalorder %s465_s9, %s730_s2 }
   0x7   :  { %p471_p2 = pnand %p469_p1, %p466_p0 }
   0x9   :  { %474 = shalt.err (!%p471_p2)
}
   0xa   :  { %s475_s14 = scalar_lea.vmem %s35_s28, 512  ;;  %p480_p4 = scmp.lt.s32.totalorder %s35_s28, %s35_s28 }
   0xb   :  { %p476_p3 = scmp.ne.s32.totalorder %s35_s28, %s475_s14  ;;  %p481_p5 = scmp.lt.s32.totalorder %s475_s14, %s475_s14 }
   0xd   :  { %p482_p6 = por %p481_p5, %p480_p4 }
   0xf   :  { %p483_p7 = pnand %p482_p6, %p476_p3 }
  0x11   :  { %486 = shalt.err (!%p483_p7)
}
  0x12   :  { %s584_s15 = smov 128   ;;  %s585_s16 = smov 8  }
  0x13   :  { %40 = dma.hbm_to_vmem [thread:$0]  %s730_s2, 512, %s35_s28, [#allocation6], %s584_s15, %s584_s15, %s585_s16  }
  0x14   :  { %s586_s19 = smov [#allocation2]   ;;  %s587_s21 = smov [#allocation7]  }
  0x15   :  { %s23_s20 = sshll.u32 %s586_s19, 4  ;;  %s48_s22 = sshll.u32 %s587_s21, 4  ;;  %s24_s20 = int_to_ptr.vmem [resolvable:$true] %s23_s20  ;;  %s49_s22 = int_to_ptr.vmem [resolvable:$true] %s48_s22 }
  0x16   :  { %s487_s25 = scalar_lea.hbm %s728_s0, 32 }
  0x17   :  { %p488_p8 = scmp.ne.s32.totalorder %s728_s0, %s487_s25  ;;  %p491_p9 = scmp.lt.u32.totalorder %s487_s25, %s728_s0 }
  0x19   :  { %p493_p10 = pnand %p491_p9, %p488_p8 }
  0x1b   :  { %496 = shalt.err (!%p493_p10)
}
  0x1c   :  { %s497_s2 = scalar_lea.vmem %s24_s20, 32  ;;  %p502_p12 = scmp.lt.s32.totalorder %s24_s20, %s24_s20 }
  0x1d   :  { %p498_p11 = scmp.ne.s32.totalorder %s24_s20, %s497_s2  ;;  %p503_p13 = scmp.lt.s32.totalorder %s497_s2, %s497_s2 }
  0x1f   :  { %p504_p0 = por %p503_p13, %p502_p12 }
  0x21   :  { %p505_p1 = pnand %p504_p0, %p498_p11 }
  0x23   :  { %508 = shalt.err (!%p505_p1)
}
  0x24   :  { %26 = dma.hbm_to_vmem [thread:$0]  %s728_s0, 32, %s24_s20, [#allocation3]  }
  0x25   :  { %s509_s12 = scalar_lea.hbm %s732_s4, 512 }
  0x26   :  { %p510_p2 = scmp.ne.s32.totalorder %s732_s4, %s509_s12  ;;  %p513_p3 = scmp.lt.u32.totalorder %s509_s12, %s732_s4 }
  0x28   :  { %p515_p4 = pnand %p513_p3, %p510_p2 }
  0x2a   :  { %518 = shalt.err (!%p515_p4)
}
  0x2b   :  { %s519_s19 = scalar_lea.vmem %s49_s22, 512  ;;  %p524_p6 = scmp.lt.s32.totalorder %s49_s22, %s49_s22 }
  0x2c   :  { %p520_p5 = scmp.ne.s32.totalorder %s49_s22, %s519_s19  ;;  %p525_p7 = scmp.lt.s32.totalorder %s519_s19, %s519_s19 }
  0x2e   :  { %p526_p8 = por %p525_p7, %p524_p6 }
  0x30   :  { %p527_p9 = pnand %p526_p8, %p520_p5 }
  0x32   :  { %530 = shalt.err (!%p527_p9)
}
  0x33   :  { %54 = dma.hbm_to_vmem [thread:$0]  %s732_s4, 512, %s49_s22, [#allocation6], %s584_s15, %s584_s15, %s585_s16  }
  0x34   :  { %s588_s21 = smov [#allocation8]   ;;  %s531_s26 = scalar_lea.hbm %s734_s6, 512 }
  0x35   :  { %s62_s23 = sshll.u32 %s588_s21, 4  ;;  %p532_p10 = scmp.ne.s32.totalorder %s734_s6, %s531_s26  ;;  %s63_s23 = int_to_ptr.vmem [resolvable:$true] %s62_s23 }
  0x36   :  { %p535_p11 = scmp.lt.u32.totalorder %s531_s26, %s734_s6 }
  0x38   :  { %p537_p12 = pnand %p535_p11, %p532_p10 }
  0x3a   :  { %540 = shalt.err (!%p537_p12)
}
  0x3b   :  { %s541_s28 = scalar_lea.vmem %s63_s23, 512  ;;  %p546_p0 = scmp.lt.s32.totalorder %s63_s23, %s63_s23 }
  0x3c   :  { %p542_p13 = scmp.ne.s32.totalorder %s63_s23, %s541_s28  ;;  %p547_p1 = scmp.lt.s32.totalorder %s541_s28, %s541_s28 }
  0x3e   :  { %p548_p2 = por %p547_p1, %p546_p0 }
  0x40   :  { %p549_p3 = pnand %p548_p2, %p542_p13 }
  0x42   :  { %552 = shalt.err (!%p549_p3)
}
  0x43   :  { %68 = dma.hbm_to_vmem [thread:$0]  %s734_s6, 512, %s63_s23, [#allocation9], %s584_s15, %s584_s15, %s585_s16  }
  0x44   :  { %575 = dma.done.wait [#allocation3], 32  }
  0x45   :  { %576 = vsyncadd [#allocation3], 4294967264 }
  0x46   :  { %577 = dma.done.wait [#allocation6], 1024  }
  0x47   :  { %578 = vsyncadd [#allocation6], 4294966272 }
  0x48   :  { %579 = dma.done.wait [#allocation9], 512  }
  0x49   :  { %580 = vsyncadd [#allocation9], 4294966784  ;;  %v589_v0 = vmov 0.0|0.0   ;;  %vm590_vm0 = vmmov 0   ;;  %v591_v1 = vmov 0.0   ;;  %v84_v2 = vld [vmem:[#allocation5] sm:$0xff] }
  0x4a   :  { %433 = vmatprep.subr.bf16.mxu0 %v589_v0  ;;  %408 = vmatprep.mubr.msk.f32.mxu0 %vm590_vm0, %v591_v1  ;;  %v85_v3 = vld [vmem:[#allocation5 + $0x8] sm:$0xff]  ;;  %v86_v4 = vld [vmem:[#allocation5 + $0x10] sm:$0xff]  ;;  %v87_v6 = vld [vmem:[#allocation5 + $0x18] sm:$0xff]  ;;  %vm95_vm1 = vcmask 261120   ;;  %vm341_vm2 = vcmask 517120   ;;  %s592_s12 = smov [#allocation10]  }
  0x4b   :  { %439 = vmatprep.subr.bf16.mxu1 %v589_v0  ;;  %419 = vmatprep.mubr.msk.f32.mxu1 %vm590_vm0, %v591_v1  ;;  %v434_v5 = vpack.c.bf16 %v85_v3, %v84_v2  ;;  %v437_v7 = vpack.c.bf16 %v87_v6, %v86_v4  ;;  %v83_v8 = vld [vmem:[#allocation2] sm:$0x3]  ;;  %v175_v9 = vld [vmem:[#allocation7] sm:$0xff]  ;;  %v176_v10 = vld [vmem:[#allocation7 + $0x8] sm:$0xff]  ;;  %s367_s13 = sshll.u32 %s592_s12, 4  ;;  %s368_s13 = int_to_ptr.vmem [resolvable:$true] %s367_s13 }
  0x4c   :  { %v259_v11 = vld [vmem:[#allocation8] sm:$0xff]  ;;  %v440_v12 = vpack.c.bf16 %v176_v10, %v175_v9  ;;  %v260_v13 = vld [vmem:[#allocation8 + $0x8] sm:$0xff]  ;;  %v177_v14 = vld [vmem:[#allocation7 + $0x10] sm:$0xff]  ;;  %p558_p5 = scmp.lt.s32.totalorder %s368_s13, %s368_s13 }
  0x4d   :  { %435 = vmatpush3.bf16.msra.mxu0 %v434_v5  ;;  %v178_v15 = vld [vmem:[#allocation7 + $0x18] sm:$0xff]  ;;  %v446_v16 = vpack.c.bf16 %v260_v13, %v259_v11  ;;  %v261_v17 = vld [vmem:[#allocation8 + $0x10] sm:$0xff] }
  0x4e   :  { %436 = vmatprep.subr.bf16.mxu0 %v589_v0  ;;  %v262_v18 = vld [vmem:[#allocation8 + $0x18] sm:$0xff]  ;;  %441 = vmatpush3.bf16.msra.mxu1 %v440_v12  ;;  %v443_v19 = vpack.c.bf16 %v178_v15, %v177_v14 }
  0x4f   :  { %442 = vmatprep.subr.bf16.mxu1 %v589_v0  ;;  %v449_v20 = vpack.c.bf16 %v262_v18, %v261_v17  ;;  %v340_v21 = vld [vmem:[%s729_s1] sm:$0x3] }
  0x50   :  { %v342_v22 = vsel %vm341_vm2, %v340_v21, 0.0  ;;  %v346_v23 = vmul.f32 %v340_v21, %v340_v21  ;;  %v378_v25 = vld [vmem:[%s731_s3] ss:$0 sm:$0xff] }
  0x51   :  { %438 = vmatpush3.bf16.msra.mxu0 %v437_v7  ;;  %343 = vadd.xlane.f32.xlu0 %v342_v22  ;;  %v381_v41 = vld [vmem:[%s733_s5] ss:$0 sm:$0xff]  ;;  %s553_s5 = scalar_lea.vmem %s368_s13, 32 }
  0x52   :  { %445 = vmatprep.subr.bf16.mxu0 %v589_v0  ;;  %444 = vmatpush3.bf16.msra.mxu1 %v443_v19  ;;  %v347_v24 = vsel %vm341_vm2, %v346_v23, 0.0  ;;  %v383_v49 = vld [vmem:[%s735_s7] ss:$0 sm:$0xff]  ;;  %p554_p4 = scmp.ne.s32.totalorder %s368_s13, %s553_s5  ;;  %p559_p6 = scmp.lt.s32.totalorder %s553_s5, %s553_s5 }
  0x54   :  { %409 = vmatmul.mubr.msk.f32.vlgmr.msra.gmra.mrb[0].mxu0 %vm95_vm1, %v83_v8  ;;  %p560_p7 = por %p559_p6, %p558_p5 }
  0x55   :  { %430 = vmatprep.mubr.msk.f32.mxu0 %vm590_vm0, %v591_v1  ;;  %447 = vmatpush3.bf16.msra.mxu0 %v446_v16 }
  0x56   :  { %448 = vmatprep.subr.bf16.mxu0 %v589_v0  ;;  %348 = vadd.xlane.f32.xlu0 %v347_v24  ;;  %p561_p8 = pnand %p560_p7, %p554_p4 }
  0x59   :  { %450 = vmatpush3.bf16.msra.mxu0 %v449_v20 }
  0xde   :  { %v344_v34 = vpop.xlane.xlu0 %343 }
  0xdf   :  { %v345_v35 = vmul.f32 0.015625, %v344_v34 }
  0xe1   :  { %v351_v37 = vmul.f32 %v345_v35, %v345_v35  ;;  %v353_v42 = vsub.f32 %v340_v21, %v345_v35 }
  0xe3   :  { %v349_v36 = vpop.xlane.xlu0 %348 }
  0xe4   :  { %v350_v38 = vmul.f32 0.015625, %v349_v36 }
  0xe6   :  { %v352_v39 = vsub.f32 %v350_v38, %v351_v37 }
  0xe8   :  { %v354_v40 = vadd.f32 1e-05, %v352_v39 }
 0x127   :  { %v165_v26 = vpop.f32.mrb[0].mxu0 }
 0x128   :  { %v166_v27 = vadd.f32 %v378_v25, %v165_v26  ;;  %v410_v28 = vpop.f32.mrb[1].mxu0 }
 0x12a   :  { %v170_v29 = vmin.f32 %v166_v27, 0.0  ;;  %vm169_vm3 = vcmp.gt.f32.partialorder %v166_v27, 0.0 }
 0x12c   :  { %v171_v30 = vmul.f32 1.442695, %v170_v29 }
 0x12e   :  { %461 = vpow2.f32 %v171_v30 }
 0x12f   :  { %463 = vrsqrt.f32 %v354_v40 }
 0x138   :  { %v462_v31 = vpop.eup %461 }
 0x139   :  { %v380_v32 = vadd.f32 -1.0, %v462_v31  ;;  %v464_v43 = vpop.eup %463 }
 0x13a   :  { %v356_v50 = vmul.f32 %v464_v43, %v353_v42 }
 0x13b   :  { %v174_v33 = vsel %vm169_vm3, %v166_v27, %v380_v32 }
 0x13c   :  { %420 = vmatmul.mubr.msk.f32.vlgmr.msra.gmra.mrb[0].mxu1 %vm95_vm1, %v174_v33  ;;  %431 = vmatmul.mubr.msk.f32.vlgmr.msra.gmra.mrb[2].mxu0 %vm95_vm1, %v174_v33 }
 0x20f   :  { %v255_v44 = vpop.f32.mrb[0].mxu1  ;;  %v336_v45 = vpop.f32.mrb[2].mxu0 }
 0x210   :  { %v256_v46 = vadd.f32 %v381_v41, %v255_v44  ;;  %v421_v47 = vpop.f32.mrb[1].mxu1  ;;  %v432_v48 = vpop.f32.mrb[3].mxu0  ;;  %v337_v53 = vadd.f32 %v383_v49, %v336_v45 }
 0x212   :  { %v357_v51 = vadd.f32 1.0, %v256_v46 }
 0x214   :  { %v358_v52 = vmul.f32 %v357_v51, %v356_v50 }
 0x216   :  { %v359_v54 = vadd.f32 %v358_v52, %v337_v53 }
 0x218   :  { %360 = vst.msk [vmem:[#allocation10] sm:$0x3] %vm341_vm2, %v359_v54 }
 0x219   :  { %564 = shalt.err (!%p561_p8)
}
 0x21a   :  { %s565_s7 = scalar_lea.hbm %s736_s8, 32 }
 0x21b   :  { %p566_p9 = scmp.ne.s32.totalorder %s736_s8, %s565_s7  ;;  %p569_p10 = scmp.lt.u32.totalorder %s565_s7, %s736_s8 }
 0x21d   :  { %p571_p11 = pnand %p569_p10, %p566_p9 }
 0x21f   :  { %574 = shalt.err (!%p571_p11)
}
 0x220   :  { %370 = dma.vmem_to_hbm [thread:$0]  %s368_s13, 32, %s736_s8, [#allocation4]  }
 0x221   :  { %581 = dma.done.wait [#allocation4], 32  }
 0x222   :  { %582 = vsyncadd [#allocation4], 4294967264 }
 0x223   :  { %374 = vsyncpa [#allocation3], 1 }
 0x224   :  { %375 = vsyncpa [#allocation6], 1 }
 0x225   :  { %376 = vsyncpa [#allocation9], 1 }
 0x226   :  { %377 = vsyncpa [#allocation4], 1 }

</bundles_post_ra>
